<compile_context>
chip_gen: v7x
topology: tpu7x:2x2x1
jax: 0.10.0
libtpu: 0.0.40
codegen_flags: <defaults>
</compile_context>

<pallas_src>
import functools
import math

import jax
import jax.numpy as jnp
from jax.experimental import pallas as pl
from jax.experimental.pallas import tpu as pltpu


# --------------------------------------------------------------------------
# kernel
# --------------------------------------------------------------------------
def _ffn_kernel(x_ref, w1_ref, b1_ref, w2_ref, b2_ref, g_ref, beta_ref,
                o_ref, acc_ref, *, eps, d_valid, matmul_dtype):
    """One (row-tile i, hidden-tile k) grid step.

    The hidden ('k') axis is a reduction: the f32 accumulator lives in VMEM
    scratch, is seeded with the linear2 bias at k == 0 and the residual +
    LayerNorm epilogue runs at the last k.
    """
    k = pl.program_id(1)
    nk = pl.num_programs(1)

    @pl.when(k == 0)
    def _init():
        # seed the accumulator with b2 (broadcast over the row tile)
        acc_ref[...] = jnp.broadcast_to(b2_ref[...].astype(jnp.float32),
                                        acc_ref.shape)

    x = x_ref[...]

    # linear1 (this hidden tile) + bias + ReLU — MXU matmul, f32 accumulation.
    h = jnp.dot(x.astype(matmul_dtype), w1_ref[...],
                preferred_element_type=jnp.float32)
    h = jnp.maximum(h + b1_ref[...], 0.0)

    # linear2 partial product for this hidden tile (dropout identity at p=0).
    acc_ref[...] += jnp.dot(h.astype(matmul_dtype), w2_ref[...],
                            preferred_element_type=jnp.float32)

    @pl.when(k == nk - 1)
    def _finalize():
        # residual add + LayerNorm over the true d_model lanes, in f32.
        r = x.astype(jnp.float32) + acc_ref[...]
        d_pad = r.shape[-1]
        inv_d = 1.0 / d_valid
        # padded lanes of r are exactly zero (zero-padded x, W2 cols, b2),
        # so a full-lane sum equals the valid-lane sum.
        mean = jnp.sum(r, axis=-1, keepdims=True) * inv_d
        cent = r - mean
        if d_pad != d_valid:            # static: only when d_model was padded
            lane = jax.lax.broadcasted_iota(jnp.int32, (1, d_pad), 1)
            cent = jnp.where(lane < d_valid, cent, 0.0)
        var = jnp.sum(cent * cent, axis=-1, keepdims=True) * inv_d
        rn = cent * jax.lax.rsqrt(var + eps)
        o_ref[...] = (rn * g_ref[...] + beta_ref[...]).astype(o_ref.dtype)


# --------------------------------------------------------------------------
# helpers
# --------------------------------------------------------------------------
def _round_up(x, m):
    return ((x + m - 1) // m) * m


def _vmem_capacity_bytes():
    try:
        return int(pltpu.get_tpu_info().vmem_capacity_bytes)
    except Exception:
        pass
    try:  # generation-aware fallback
        kind = jax.devices()[0].device_kind.lower()
        if "v7" in kind:
            return 64 << 20           # v7x: 64 MiB per TensorCore
        return 128 << 20              # v4/v5e/v5p/v6e: 128 MiB
    except Exception:
        return 64 << 20               # conservative last resort


def _block_spec(shape, index_map, buffers=None):
    """BlockSpec with an optional explicit buffer count (graceful fallback)."""
    if buffers is not None and hasattr(pl, "Buffered"):
        try:
            return pl.BlockSpec(shape, index_map,
                                pipeline_mode=pl.Buffered(buffers))
        except (TypeError, ValueError):
            pass
    return pl.BlockSpec(shape, index_map)


def _choose_tiles(n_rows, d_pad, f_pad, io_bytes, wgt_bytes, budget, row_align):
    """Pick (tm, tf) = (row tile, hidden tile) that fits the VMEM budget."""

    def vmem_needed(tm, tf):
        io = 2 * (2 * tm * d_pad * io_bytes)              # x + out, 2 buffers
        acc = tm * d_pad * 4                              # f32 accumulator
        wts = 2 * (2 * d_pad * tf * wgt_bytes + tf * 4)   # W1/W2/b1 tiles
        cnst = 3 * d_pad * 4                              # b2 / gamma / beta
        tmp = tm * tf * (4 + wgt_bytes) + tm * d_pad * 4  # h + casts + LN tmps
        return io + acc + wts + cnst + tmp

    n_al = _round_up(max(n_rows, 1), row_align)
    tm_cands = []
    for t in (1024, 512, 256, 128, 64, 32, 16):           # 256-aligned first
        t = _round_up(min(t, n_al), row_align)
        if t not in tm_cands:
            tm_cands.append(t)
    tf_cands = sorted({min(f_pad, v) for v in
                       (f_pad, 8192, 4096, 2048, 1024, 512, 256, 128)},
                      reverse=True)

    tm, tf = tm_cands[-1], 128                             # last-resort tiles
    for cand_tm in tm_cands:
        hit = next((cand_tf for cand_tf in tf_cands
                    if vmem_needed(cand_tm, cand_tf) <= budget), None)
        if hit is not None:
            tm, tf = cand_tm, hit
            break

    # keep >= 2 row tiles for large inputs so the 'parallel' row axis can
    # shard across both TensorCores on v7x-class chips.
    if n_rows >= 512 and _round_up(n_rows, tm) // tm < 2:
        tm = min(tm, _round_up((n_rows + 1) // 2, row_align))
    return tm, tf


# --------------------------------------------------------------------------
# parameter preparation (hoisted: run once per parameter set, not per call)
# --------------------------------------------------------------------------
def prepare_ffn_params(w1, b1, w2, b2, gamma, beta, *,
                       matmul_dtype=jnp.bfloat16):
    d_model, dff = w1.shape
    d_pad = _round_up(d_model, 128)
    f_pad = _round_up(dff, 128)
    w1p = jnp.pad(w1, ((0, d_pad - d_model), (0, f_pad - dff))).astype(matmul_dtype)
    w2p = jnp.pad(w2, ((0, f_pad - dff), (0, d_pad - d_model))).astype(matmul_dtype)
    b1p = jnp.pad(b1.astype(jnp.float32), (0, f_pad - dff)).reshape(1, f_pad)
    b2p = jnp.pad(b2.astype(jnp.float32), (0, d_pad - d_model)).reshape(1, d_pad)
    gp = jnp.pad(gamma.astype(jnp.float32), (0, d_pad - d_model)).reshape(1, d_pad)
    bp = jnp.pad(beta.astype(jnp.float32), (0, d_pad - d_model)).reshape(1, d_pad)
    return {"w1": w1p, "b1": b1p, "w2": w2p, "b2": b2p, "gamma": gp, "beta": bp,
            "d_model": d_model, "dff": dff, "matmul_dtype": matmul_dtype}


# --------------------------------------------------------------------------
# wrapper
# --------------------------------------------------------------------------
def ffn_layer(x, w1=None, b1=None, w2=None, b2=None, gamma=None, beta=None, *,
              eps=1e-5, matmul_dtype=jnp.bfloat16, prepared=None,
              tm=None, tf=None, weight_buffers=None):
    """x: (..., d_model).  Returns same shape/dtype as x."""
    if prepared is None:
        prepared = prepare_ffn_params(w1, b1, w2, b2, gamma, beta,
                                      matmul_dtype=matmul_dtype)
    matmul_dtype = prepared["matmul_dtype"]
    d_model = prepared["d_model"]
    w1p, b1p = prepared["w1"], prepared["b1"]
    w2p, b2p = prepared["w2"], prepared["b2"]
    gp, bp = prepared["gamma"], prepared["beta"]
    d_pad, f_pad = w1p.shape
    assert x.shape[-1] == d_model, "x feature dim does not match the parameters"

    orig_shape = x.shape
    x2 = x.reshape(-1, d_model)
    n = x2.shape[0]

    io_bytes = x.dtype.itemsize
    wgt_bytes = jnp.dtype(matmul_dtype).itemsize
    # sub-32-bit MXU operands pack 2 rows per sublane: keep row tiles 16-aligned
    row_align = 16 if wgt_bytes < 4 else 8

    capacity = _vmem_capacity_bytes()
    vmem_limit = int(capacity * 0.9)            # what we tell the compiler
    budget = int(vmem_limit * 0.85)             # what the tile chooser may use

    auto_tm, auto_tf = _choose_tiles(n, d_pad, f_pad, io_bytes, wgt_bytes,
                                     budget, row_align)
    tm = auto_tm if tm is None else max(row_align, _round_up(int(tm), row_align))
    tf = auto_tf if tf is None else max(128, _round_up(int(tf), 128))
    tf = min(tf, f_pad)
    while f_pad % tf != 0:                      # tf must divide f_pad exactly
        tf -= 128

    n_pad = _round_up(n, tm)
    if n_pad != n or d_pad != d_model:
        xp = jnp.pad(x2, ((0, n_pad - n), (0, d_pad - d_model)))
    else:
        xp = x2                                 # no extra copy when aligned

    n_i = n_pad // tm
    n_k = f_pad // tf

    # grid-invariant operands: single-buffered (double buffering buys nothing)
    const_bufs = 1
    w_bufs = 1 if n_k == 1 else weight_buffers  # None -> default double-buffer

    kernel = functools.partial(_ffn_kernel, eps=eps, d_valid=d_model,
                               matmul_dtype=matmul_dtype)

    cost = pl.CostEstimate(
        flops=4 * n_pad * d_pad * f_pad,                    # two matmuls
        transcendentals=n_pad,                              # one rsqrt per row
        bytes_accessed=(2 * n_pad * d_pad * io_bytes
                        + n_i * (w1p.size + w2p.size) * wgt_bytes
                        + n_i * (b1p.size + b2p.size + gp.size + bp.size) * 4))

    out = pl.pallas_call(
        kernel,
        out_shape=jax.ShapeDtypeStruct((n_pad, d_pad), x.dtype),
        grid_spec=pltpu.PrefetchScalarGridSpec(
            num_scalar_prefetch=0,
            grid=(n_i, n_k),
            in_specs=[
                _block_spec((tm, d_pad), lambda i, k: (i, 0)),             # x rows
                _block_spec((d_pad, tf), lambda i, k: (0, k), w_bufs),     # W1 tile
                _block_spec((1, tf), lambda i, k: (0, k), w_bufs),         # b1 tile
                _block_spec((tf, d_pad), lambda i, k: (k, 0), w_bufs),     # W2 tile
                _block_spec((1, d_pad), lambda i, k: (0, 0), const_bufs),  # b2
                _block_spec((1, d_pad), lambda i, k: (0, 0), const_bufs),  # gamma
                _block_spec((1, d_pad), lambda i, k: (0, 0), const_bufs),  # beta
            ],
            out_specs=_block_spec((tm, d_pad), lambda i, k: (i, 0)),
            scratch_shapes=[pltpu.VMEM((tm, d_pad), jnp.float32)],
        ),
        compiler_params=pltpu.CompilerParams(
            dimension_semantics=("parallel", "arbitrary"),
            vmem_limit_bytes=vmem_limit),
        cost_estimate=cost,
    )(xp, w1p, b1p, w2p, b2p, gp, bp)

    if n_pad != n or d_pad != d_model:
        out = out[:n, :d_model]
    return out.reshape(orig_shape)


# --------------------------------------------------------------------------
# params / reference
# --------------------------------------------------------------------------
def xavier_uniform(key, shape, dtype=jnp.float32):
    fan_in, fan_out = shape
    limit = math.sqrt(6.0 / (fan_in + fan_out))
    return jax.random.uniform(key, shape, dtype, minval=-limit, maxval=limit)


def init_params(key, d_model, dim_feedforward):
    k1, k2, k3, k4 = jax.random.split(key, 4)
    w1 = xavier_uniform(k1, (d_model, dim_feedforward))      # (in, out)
    w2 = xavier_uniform(k2, (dim_feedforward, d_model))
    bound1 = 1.0 / math.sqrt(d_model)
    bound2 = 1.0 / math.sqrt(dim_feedforward)
    b1 = jax.random.uniform(k3, (dim_feedforward,), jnp.float32, -bound1, bound1)
    b2 = jax.random.uniform(k4, (d_model,), jnp.float32, -bound2, bound2)
    gamma = jnp.ones((d_model,), jnp.float32)
    beta = jnp.zeros((d_model,), jnp.float32)
    return w1, b1, w2, b2, gamma, beta


def ffn_reference(x, w1, b1, w2, b2, gamma, beta, eps=1e-5):
    h = jnp.maximum(x @ w1 + b1, 0.0)
    y = h @ w2 + b2
    r = x + y
    mean = jnp.mean(r, axis=-1, keepdims=True)
    var = jnp.mean((r - mean) ** 2, axis=-1, keepdims=True)
    return (r - mean) / jnp.sqrt(var + eps) * gamma + beta


# --------------------------------------------------------------------------
# demo / self-check
# --------------------------------------------------------------------------
if __name__ == "__main__":
    key = jax.random.PRNGKey(0)
    d_model = 32
    dim_feedforward = 64
    seq, batch = 8, 2

    kx, kp = jax.random.split(key)
    x = jax.random.normal(kx, (seq, batch, d_model), jnp.float32)
    params = init_params(kp, d_model, dim_feedforward)
    ref = ffn_reference(x, *params)

    # parameters are padded / cast once (hoisted out of the forward pass)
    prep_f32 = prepare_ffn_params(*params, matmul_dtype=jnp.float32)
    prep_bf16 = prepare_ffn_params(*params, matmul_dtype=jnp.bfloat16)

    # strict-precision path (f32 MXU operands) — tight tolerance
    out_f32 = jax.block_until_ready(ffn_layer(x, prepared=prep_f32))
    assert out_f32.shape == x.shape and out_f32.dtype == x.dtype
    assert jnp.allclose(out_f32, ref, atol=1e-5, rtol=1e-5), "f32 path mismatch"

    # fast path (default): bf16 MXU operands, f32 accumulation
    out = jax.block_until_ready(ffn_layer(x, prepared=prep_bf16))
    assert out.shape == x.shape and out.dtype == x.dtype
    assert jnp.allclose(out, ref, atol=5e-2, rtol=5e-2), "bf16 path mismatch"

    # raw-parameter convenience path (pads/casts inside the call)
    out_raw = jax.block_until_ready(ffn_layer(x, *params))
    assert jnp.allclose(out_raw, out, atol=1e-6, rtol=1e-6), "raw path mismatch"

    print("KERNEL_OK")
</pallas_src>

<mosaic_0001>
module attributes {stable_mosaic.version = 11 : i64} {
  func.func @_ffn_kernel(%arg0: i32, %arg1: i32, %arg2: memref<16x128xf32, #tpu.memory_space<vmem>>, %arg3: memref<128x128xf32, #tpu.memory_space<vmem>>, %arg4: memref<1x128xf32, #tpu.memory_space<vmem>>, %arg5: memref<128x128xf32, #tpu.memory_space<vmem>>, %arg6: memref<1x128xf32, #tpu.memory_space<vmem>>, %arg7: memref<1x128xf32, #tpu.memory_space<vmem>>, %arg8: memref<1x128xf32, #tpu.memory_space<vmem>>, %arg9: memref<16x128xf32, #tpu.memory_space<vmem>>, %arg10: memref<16x128xf32, #tpu.memory_space<vmem>>) attributes {dimension_semantics = [#tpu.dimension_semantics<parallel>, #tpu.dimension_semantics<arbitrary>], iteration_bounds = array<i64: 1, 1>, scalar_prefetch = 0 : i64, scratch_operands = 1 : i64, tpu.core_type = #tpu.core_type<tc>, window_params = [{transform_indices = @transform_0, window_bounds = array<i64: 16, 128>}, {pipeline_mode = #tpu.pipeline_mode<synchronous>, transform_indices = @transform_1, window_bounds = array<i64: 128, 128>}, {pipeline_mode = #tpu.pipeline_mode<synchronous>, transform_indices = @transform_2, window_bounds = array<i64: 1, 128>}, {pipeline_mode = #tpu.pipeline_mode<synchronous>, transform_indices = @transform_3, window_bounds = array<i64: 128, 128>}, {pipeline_mode = #tpu.pipeline_mode<synchronous>, transform_indices = @transform_4, window_bounds = array<i64: 1, 128>}, {pipeline_mode = #tpu.pipeline_mode<synchronous>, transform_indices = @transform_5, window_bounds = array<i64: 1, 128>}, {pipeline_mode = #tpu.pipeline_mode<synchronous>, transform_indices = @transform_6, window_bounds = array<i64: 1, 128>}, {transform_indices = @transform_7, window_bounds = array<i64: 16, 128>}]} {
    %c0_i32 = arith.constant 0 : i32
    %0 = arith.cmpi eq, %arg1, %c0_i32 : i32
    %1 = arith.extui %0 : i1 to i32
    %c0_i32_0 = arith.constant 0 : i32
    %2 = arith.cmpi ne, %1, %c0_i32_0 : i32
    scf.if %2 {
      %c0_16 = arith.constant 0 : index
      %c0_17 = arith.constant 0 : index
      %19 = vector.load %arg6[%c0_16, %c0_17] : memref<1x128xf32, #tpu.memory_space<vmem>>, vector<1x128xf32>
      %20 = vector.shape_cast %19 : vector<1x128xf32> to vector<1x128xf32>
      %21 = vector.broadcast %20 : vector<1x128xf32> to vector<16x128xf32>
      %c0_18 = arith.constant 0 : index
      %c0_19 = arith.constant 0 : index
      %22 = vector.load %arg10[%c0_18, %c0_19] : memref<16x128xf32, #tpu.memory_space<vmem>>, vector<16x128xf32>
      tpu.vector_store %arg10[%c0_18, %c0_19], %21 {strides = array<i32>} : memref<16x128xf32, #tpu.memory_space<vmem>>, vector<16x128xf32>,
    } else {
    }
    %c0 = arith.constant 0 : index
    %c0_1 = arith.constant 0 : index
    %3 = vector.load %arg2[%c0, %c0_1] : memref<16x128xf32, #tpu.memory_space<vmem>>, vector<16x128xf32>
    %c0_2 = arith.constant 0 : index
    %c0_3 = arith.constant 0 : index
    %4 = vector.load %arg3[%c0_2, %c0_3] : memref<128x128xf32, #tpu.memory_space<vmem>>, vector<128x128xf32>
    %cst = arith.constant dense<0.000000e+00> : vector<16x128xf32>
    %5 = tpu.matmul %3, %4, %cst {dimension_numbers = #tpu.dot_dimension_numbers<[1], [0], [0], [1], [0, 0, 1, 1], [], []>} : vector<16x128xf32>, vector<128x128xf32>, vector<16x128xf32> -> vector<16x128xf32>
    %c0_4 = arith.constant 0 : index
    %c0_5 = arith.constant 0 : index
    %6 = vector.load %arg4[%c0_4, %c0_5] : memref<1x128xf32, #tpu.memory_space<vmem>>, vector<1x128xf32>
    %7 = vector.broadcast %6 : vector<1x128xf32> to vector<16x128xf32>
    %8 = arith.addf %5, %7 : vector<16x128xf32>
    %cst_6 = arith.constant 0.000000e+00 : f32
    %9 = vector.broadcast %cst_6 : f32 to vector<16x128xf32>
    %10 = arith.maximumf %8, %9 : vector<16x128xf32>
    %c0_7 = arith.constant 0 : index
    %c0_8 = arith.constant 0 : index
    %11 = vector.load %arg10[%c0_7, %c0_8] : memref<16x128xf32, #tpu.memory_space<vmem>>, vector<16x128xf32>
    %c0_9 = arith.constant 0 : index
    %c0_10 = arith.constant 0 : index
    %12 = vector.load %arg5[%c0_9, %c0_10] : memref<128x128xf32, #tpu.memory_space<vmem>>, vector<128x128xf32>
    %cst_11 = arith.constant dense<0.000000e+00> : vector<16x128xf32>
    %13 = tpu.matmul %10, %12, %cst_11 {dimension_numbers = #tpu.dot_dimension_numbers<[1], [0], [0], [1], [0, 0, 1, 1], [], []>} : vector<16x128xf32>, vector<128x128xf32>, vector<16x128xf32> -> vector<16x128xf32>
    %14 = arith.addf %11, %13 : vector<16x128xf32>
    %c0_12 = arith.constant 0 : index
    %c0_13 = arith.constant 0 : index
    %15 = vector.load %arg10[%c0_12, %c0_13] : memref<16x128xf32, #tpu.memory_space<vmem>>, vector<16x128xf32>
    tpu.vector_store %arg10[%c0_12, %c0_13], %14 {strides = array<i32>} : memref<16x128xf32, #tpu.memory_space<vmem>>, vector<16x128xf32>,
    %c0_i32_14 = arith.constant 0 : i32
    %16 = arith.cmpi eq, %arg1, %c0_i32_14 : i32
    %17 = arith.extui %16 : i1 to i32
    %c0_i32_15 = arith.constant 0 : i32
    %18 = arith.cmpi ne, %17, %c0_i32_15 : i32
    scf.if %18 {
      %c0_16 = arith.constant 0 : index
      %c0_17 = arith.constant 0 : index
      %19 = vector.load %arg10[%c0_16, %c0_17] : memref<16x128xf32, #tpu.memory_space<vmem>>, vector<16x128xf32>
      %20 = arith.addf %3, %19 : vector<16x128xf32>
      %cst_18 = arith.constant dense<0.000000e+00> : vector<16xf32>
      %21 = vector.multi_reduction <add>, %20, %cst_18 [1] : vector<16x128xf32> to vector<16xf32>
      %22 = vector.shape_cast %21 : vector<16xf32> to vector<16x1xf32>
      %cst_19 = arith.constant 3.125000e-02 : f32
      %23 = vector.broadcast %cst_19 : f32 to vector<16x1xf32>
      %24 = arith.mulf %22, %23 : vector<16x1xf32>
      %25 = vector.broadcast %24 : vector<16x1xf32> to vector<16x128xf32>
      %26 = arith.subf %20, %25 : vector<16x128xf32>
      %27 = tpu.iota {dimensions = array<i32: 1>} : vector<1x128xi32>
      %c32_i32 = arith.constant 32 : i32
      %28 = vector.broadcast %c32_i32 : i32 to vector<1x128xi32>
      %29 = arith.cmpi slt, %27, %28 : vector<1x128xi32>
      %cst_20 = arith.constant 0.000000e+00 : f32
      %30 = vector.shape_cast %29 : vector<1x128xi1> to vector<1x128xi1>
      %31 = vector.broadcast %30 : vector<1x128xi1> to vector<16x128xi1>
      %32 = vector.broadcast %cst_20 : f32 to vector<16x128xf32>
      %33 = arith.select %31, %26, %32 : vector<16x128xi1>, vector<16x128xf32>
      %34 = arith.mulf %33, %33 : vector<16x128xf32>
      %cst_21 = arith.constant dense<0.000000e+00> : vector<16xf32>
      %35 = vector.multi_reduction <add>, %34, %cst_21 [1] : vector<16x128xf32> to vector<16xf32>
      %36 = vector.shape_cast %35 : vector<16xf32> to vector<16x1xf32>
      %cst_22 = arith.constant 3.125000e-02 : f32
      %37 = vector.broadcast %cst_22 : f32 to vector<16x1xf32>
      %38 = arith.mulf %36, %37 : vector<16x1xf32>
      %cst_23 = arith.constant 9.99999974E-6 : f32
      %39 = vector.broadcast %cst_23 : f32 to vector<16x1xf32>
      %40 = arith.addf %38, %39 : vector<16x1xf32>
      %41 = math.rsqrt %40 : vector<16x1xf32>
      %42 = vector.broadcast %41 : vector<16x1xf32> to vector<16x128xf32>
      %43 = arith.mulf %33, %42 : vector<16x128xf32>
      %c0_24 = arith.constant 0 : index
      %c0_25 = arith.constant 0 : index
      %44 = vector.load %arg7[%c0_24, %c0_25] : memref<1x128xf32, #tpu.memory_space<vmem>>, vector<1x128xf32>
      %45 = vector.broadcast %44 : vector<1x128xf32> to vector<16x128xf32>
      %46 = arith.mulf %43, %45 : vector<16x128xf32>
      %c0_26 = arith.constant 0 : index
      %c0_27 = arith.constant 0 : index
      %47 = vector.load %arg8[%c0_26, %c0_27] : memref<1x128xf32, #tpu.memory_space<vmem>>, vector<1x128xf32>
      %48 = vector.broadcast %47 : vector<1x128xf32> to vector<16x128xf32>
      %49 = arith.addf %46, %48 : vector<16x128xf32>
      %c0_28 = arith.constant 0 : index
      %c0_29 = arith.constant 0 : index
      %50 = vector.load %arg9[%c0_28, %c0_29] : memref<16x128xf32, #tpu.memory_space<vmem>>, vector<16x128xf32>
      tpu.vector_store %arg9[%c0_28, %c0_29], %49 {strides = array<i32>} : memref<16x128xf32, #tpu.memory_space<vmem>>, vector<16x128xf32>,
    } else {
    }
    return
  }
  func.func @transform_0(%arg0: i32, %arg1: i32) -> (i32, i32) {
    %c0_i32 = arith.constant 0 : i32
    %c0_i32_0 = arith.constant 0 : i32
    return %arg0, %c0_i32 : i32, i32
  }
  func.func @transform_1(%arg0: i32, %arg1: i32) -> (i32, i32) {
    %c0_i32 = arith.constant 0 : i32
    %c0_i32_0 = arith.constant 0 : i32
    return %c0_i32, %arg1 : i32, i32
  }
  func.func @transform_2(%arg0: i32, %arg1: i32) -> (i32, i32) {
    %c0_i32 = arith.constant 0 : i32
    %c0_i32_0 = arith.constant 0 : i32
    return %c0_i32, %arg1 : i32, i32
  }
  func.func @transform_3(%arg0: i32, %arg1: i32) -> (i32, i32) {
    %c0_i32 = arith.constant 0 : i32
    %c0_i32_0 = arith.constant 0 : i32
    return %arg1, %c0_i32 : i32, i32
  }
  func.func @transform_4(%arg0: i32, %arg1: i32) -> (i32, i32) {
    %c0_i32 = arith.constant 0 : i32
    %c0_i32_0 = arith.constant 0 : i32
    %c0_i32_1 = arith.constant 0 : i32
    return %c0_i32, %c0_i32_0 : i32, i32
  }
  func.func @transform_5(%arg0: i32, %arg1: i32) -> (i32, i32) {
    %c0_i32 = arith.constant 0 : i32
    %c0_i32_0 = arith.constant 0 : i32
    %c0_i32_1 = arith.constant 0 : i32
    return %c0_i32, %c0_i32_0 : i32, i32
  }
  func.func @transform_6(%arg0: i32, %arg1: i32) -> (i32, i32) {
    %c0_i32 = arith.constant 0 : i32
    %c0_i32_0 = arith.constant 0 : i32
    %c0_i32_1 = arith.constant 0 : i32
    return %c0_i32, %c0_i32_0 : i32, i32
  }
  func.func @transform_7(%arg0: i32, %arg1: i32) -> (i32, i32) {
    %c0_i32 = arith.constant 0 : i32
    %c0_i32_0 = arith.constant 0 : i32
    return %arg0, %c0_i32 : i32, i32
  }
}

</mosaic_0001>

<bundles_post_ra>
// kernel: tpu_custom_call.1
= control target key start
LH: loop header
LB: loop body
LE: loop exit
PB: predicated region body
PF: predicated region fallthrough
CT: control target
= control target key end

     0   :  { %12 = vsyncpa [#allocation4], 0  ;;  %s952_s0 = inlined_call_operand.hbm [shape: f32[16,128], index: 0, kind: input, shape index: {}]   ;;  %s953_s1 = inlined_call_operand.hbm [shape: f32[128,128], index: 1, kind: input, shape index: {}]   ;;  %s954_s2 = inlined_call_operand.hbm [shape: f32[1,128], index: 2, kind: input, shape index: {}]   ;;  %s955_s3 = inlined_call_operand.hbm [shape: f32[128,128], index: 3, kind: input, shape index: {}]   ;;  %s956_s4 = inlined_call_operand.hbm [shape: f32[1,128], index: 4, kind: input, shape index: {}]   ;;  %s957_s5 = inlined_call_operand.hbm [shape: f32[1,128], index: 5, kind: input, shape index: {}]   ;;  %s958_s6 = inlined_call_operand.hbm [shape: f32[1,128], index: 6, kind: input, shape index: {}]   ;;  %s959_s7 = inlined_call_operand.hbm [shape: f32[16,128], index: 7, kind: output, shape index: {}]  }
   0x1   :  { %13 = vsyncpa [#allocation7], 0 }
   0x2   :  { %14 = vsyncpa [#allocation10], 0 }
   0x3   :  { %15 = vsyncpa [#allocation13], 0 }
   0x4   :  { %16 = vsyncpa [#allocation5], 0  ;;  %s776_s24 = smov [#allocation6]   ;;  %s777_s26 = smov [#allocation9]  }
   0x5   :  { %s34_s25 = sshll.u32 %s776_s24, 4  ;;  %s56_s27 = sshll.u32 %s777_s26, 4  ;;  %s35_s25 = int_to_ptr.vmem [resolvable:$true] %s34_s25  ;;  %s826_s27 = int_to_ptr.vmem [resolvable:$true] %s56_s27 }
   0x6   :  { %s590_s30 = scalar_lea.hbm %s953_s1, 2048 }
   0x7   :  { %p591_p0 = scmp.ne.s32.totalorder %s953_s1, %s590_s30  ;;  %p594_p1 = scmp.lt.u32.totalorder %s590_s30, %s953_s1 }
   0x9   :  { %p596_p2 = pnand %p594_p1, %p591_p0 }
   0xb   :  { %599 = shalt.err (!%p596_p2)
}
   0xc   :  { %s600_s12 = scalar_lea.vmem %s35_s25, 2048  ;;  %p605_p4 = scmp.lt.s32.totalorder %s35_s25, %s35_s25 }
   0xd   :  { %p601_p3 = scmp.ne.s32.totalorder %s35_s25, %s600_s12  ;;  %p606_p5 = scmp.lt.s32.totalorder %s600_s12, %s600_s12 }
   0xf   :  { %p607_p6 = por %p606_p5, %p605_p4 }
  0x11   :  { %p608_p7 = pnand %p607_p6, %p601_p3 }
  0x13   :  { %611 = shalt.err (!%p608_p7)
}
  0x14   :  { %s778_s13 = smov 128   ;;  %s779_s14 = smov 8  }
  0x15   :  { %40 = dma.hbm_to_vmem [thread:$0]  %s953_s1, 2048, %s35_s25, [#allocation7], %s778_s13, %s778_s13, %s779_s14  }
  0x16   :  { %s612_s19 = scalar_lea.hbm %s955_s3, 2048 }
  0x17   :  { %p613_p8 = scmp.ne.s32.totalorder %s955_s3, %s612_s19  ;;  %p616_p9 = scmp.lt.u32.totalorder %s612_s19, %s955_s3 }
  0x19   :  { %p618_p10 = pnand %p616_p9, %p613_p8 }
  0x1b   :  { %621 = shalt.err (!%p618_p10)
}
  0x1c   :  { %s622_s24 = scalar_lea.vmem %s826_s27, 2048  ;;  %p627_p12 = scmp.lt.s32.totalorder %s826_s27, %s826_s27 }
  0x1d   :  { %p623_p11 = scmp.ne.s32.totalorder %s826_s27, %s622_s24  ;;  %p628_p13 = scmp.lt.s32.totalorder %s622_s24, %s622_s24 }
  0x1f   :  { %p629_p0 = por %p628_p13, %p627_p12 }
  0x21   :  { %p630_p1 = pnand %p629_p0, %p623_p11 }
  0x23   :  { %633 = shalt.err (!%p630_p1)
}
  0x24   :  { %62 = dma.hbm_to_vmem [thread:$0]  %s955_s3, 2048, %s826_s27, [#allocation10], %s778_s13, %s778_s13, %s779_s14  }
  0x25   :  { %s780_s26 = smov [#allocation12]   ;;  %s781_s29 = smov [#allocation3]  }
  0x26   :  { %s79_s28 = sshll.u32 %s780_s26, 4  ;;  %s22_s30 = sshll.u32 %s781_s29, 4  ;;  %s80_s28 = int_to_ptr.vmem [resolvable:$true] %s79_s28  ;;  %s863_s30 = int_to_ptr.vmem [resolvable:$true] %s22_s30 }
  0x27   :  { %s634_s10 = scalar_lea.hbm %s957_s5, 16 }
  0x28   :  { %p635_p2 = scmp.ne.s32.totalorder %s957_s5, %s634_s10  ;;  %p638_p3 = scmp.lt.u32.totalorder %s634_s10, %s957_s5 }
  0x2a   :  { %p640_p4 = pnand %p638_p3, %p635_p2 }
  0x2c   :  { %643 = shalt.err (!%p640_p4)
}
  0x2d   :  { %s644_s3 = scalar_lea.vmem %s80_s28, 16  ;;  %s648_s27 = scalar_lea.vmem %s80_s28, 32 }
  0x2e   :  { %p645_p5 = scmp.ne.s32.totalorder %s80_s28, %s644_s3  ;;  %p649_p6 = scmp.lt.s32.totalorder %s80_s28, %s80_s28 }
  0x2f   :  { %p650_p7 = scmp.lt.s32.totalorder %s648_s27, %s644_s3 }
  0x31   :  { %p651_p8 = por %p650_p7, %p649_p6 }
  0x33   :  { %p652_p9 = pnand %p651_p8, %p645_p5 }
  0x35   :  { %655 = shalt.err (!%p652_p9)
}
  0x36   :  { %82 = dma.hbm_to_vmem [thread:$0]  %s957_s5, 16, %s80_s28, [#allocation13]  }
  0x37   :  { %s656_s21 = scalar_lea.hbm %s952_s0, 256 }
  0x38   :  { %p657_p10 = scmp.ne.s32.totalorder %s952_s0, %s656_s21  ;;  %p660_p11 = scmp.lt.u32.totalorder %s656_s21, %s952_s0 }
  0x3a   :  { %p662_p12 = pnand %p660_p11, %p657_p10 }
  0x3c   :  { %665 = shalt.err (!%p662_p12)
}
  0x3d   :  { %s666_s25 = scalar_lea.vmem %s863_s30, 256  ;;  %p671_p0 = scmp.lt.s32.totalorder %s863_s30, %s863_s30 }
  0x3e   :  { %p667_p13 = scmp.ne.s32.totalorder %s863_s30, %s666_s25  ;;  %p672_p1 = scmp.lt.s32.totalorder %s666_s25, %s666_s25 }
  0x40   :  { %p673_p2 = por %p672_p1, %p671_p0 }
  0x42   :  { %p674_p3 = pnand %p673_p2, %p667_p13 }
  0x44   :  { %677 = shalt.err (!%p674_p3)
}
  0x45   :  { %28 = dma.hbm_to_vmem [thread:$0]  %s952_s0, 256, %s863_s30, [#allocation4], %s778_s13, %s778_s13, %s779_s14  }
  0x46   :  { %s782_s28 = smov [#allocation8]   ;;  %s783_s8 = smov [#allocation11]  }
  0x47   :  { %s47_s29 = sshll.u32 %s782_s28, 4  ;;  %s69_s9 = sshll.u32 %s783_s8, 4  ;;  %s48_s29 = int_to_ptr.vmem [resolvable:$true] %s47_s29  ;;  %s70_s9 = int_to_ptr.vmem [resolvable:$true] %s69_s9 }
  0x48   :  { %s678_s12 = scalar_lea.hbm %s954_s2, 16 }
  0x49   :  { %p679_p4 = scmp.ne.s32.totalorder %s954_s2, %s678_s12  ;;  %p682_p5 = scmp.lt.u32.totalorder %s678_s12, %s954_s2 }
  0x4b   :  { %p684_p6 = pnand %p682_p5, %p679_p4 }
  0x4d   :  { %687 = shalt.err (!%p684_p6)
}
  0x4e   :  { %s688_s0 = scalar_lea.vmem %s48_s29, 16  ;;  %s692_s30 = scalar_lea.vmem %s48_s29, 32 }
  0x4f   :  { %p689_p7 = scmp.ne.s32.totalorder %s48_s29, %s688_s0  ;;  %p693_p8 = scmp.lt.s32.totalorder %s48_s29, %s48_s29 }
  0x50   :  { %p694_p9 = scmp.lt.s32.totalorder %s692_s30, %s688_s0 }
  0x52   :  { %p695_p10 = por %p694_p9, %p693_p8 }
  0x54   :  { %p696_p11 = pnand %p695_p10, %p689_p7 }
  0x56   :  { %699 = shalt.err (!%p696_p11)
}
  0x57   :  { %50 = dma.hbm_to_vmem [thread:$0]  %s954_s2, 16, %s48_s29, [#allocation7]  }
  0x58   :  { %s700_s21 = scalar_lea.hbm %s956_s4, 16 }
  0x59   :  { %p701_p12 = scmp.ne.s32.totalorder %s956_s4, %s700_s21  ;;  %p704_p13 = scmp.lt.u32.totalorder %s700_s21, %s956_s4 }
  0x5b   :  { %p706_p0 = pnand %p704_p13, %p701_p12 }
  0x5d   :  { %709 = shalt.err (!%p706_p0)
}
  0x5e   :  { %s710_s25 = scalar_lea.vmem %s70_s9, 16  ;;  %s714_s5 = scalar_lea.vmem %s70_s9, 32 }
  0x5f   :  { %p711_p1 = scmp.ne.s32.totalorder %s70_s9, %s710_s25  ;;  %p715_p2 = scmp.lt.s32.totalorder %s70_s9, %s70_s9 }
  0x60   :  { %p716_p3 = scmp.lt.s32.totalorder %s714_s5, %s710_s25 }
  0x62   :  { %p717_p4 = por %p716_p3, %p715_p2 }
  0x64   :  { %p718_p5 = pnand %p717_p4, %p711_p1 }
  0x66   :  { %721 = shalt.err (!%p718_p5)
}
  0x67   :  { %72 = dma.hbm_to_vmem [thread:$0]  %s956_s4, 16, %s70_s9, [#allocation10]  }
  0x68   :  { %s784_s28 = smov [#allocation14]   ;;  %s722_s11 = scalar_lea.hbm %s958_s6, 16 }
  0x69   :  { %s89_s29 = sshll.u32 %s784_s28, 4  ;;  %p723_p6 = scmp.ne.s32.totalorder %s958_s6, %s722_s11  ;;  %s90_s29 = int_to_ptr.vmem [resolvable:$true] %s89_s29 }
  0x6a   :  { %p726_p7 = scmp.lt.u32.totalorder %s722_s11, %s958_s6 }
  0x6c   :  { %p728_p8 = pnand %p726_p7, %p723_p6 }
  0x6e   :  { %731 = shalt.err (!%p728_p8)
}
  0x6f   :  { %s732_s27 = scalar_lea.vmem %s90_s29, 16  ;;  %s736_s4 = scalar_lea.vmem %s90_s29, 32 }
  0x70   :  { %p733_p9 = scmp.ne.s32.totalorder %s90_s29, %s732_s27  ;;  %p737_p10 = scmp.lt.s32.totalorder %s90_s29, %s90_s29 }
  0x71   :  { %p738_p11 = scmp.lt.s32.totalorder %s736_s4, %s732_s27 }
  0x73   :  { %p739_p12 = por %p738_p11, %p737_p10 }
  0x75   :  { %p740_p13 = pnand %p739_p12, %p733_p9 }
  0x77   :  { %743 = shalt.err (!%p740_p13)
}
  0x78   :  { %92 = dma.hbm_to_vmem [thread:$0]  %s958_s6, 16, %s90_s29, [#allocation13]  }
  0x79   :  { %766 = dma.done.wait [#allocation4], 256  }
  0x7a   :  { %767 = vsyncadd [#allocation4], 4294967040 }
  0x7b   :  { %768 = dma.done.wait [#allocation7], 2064  }
  0x7c   :  { %769 = vsyncadd [#allocation7], 4294965232 }
  0x7d   :  { %770 = dma.done.wait [#allocation10], 2064  }
  0x7e   :  { %771 = vsyncadd [#allocation10], 4294965232 }
  0x7f   :  { %772 = dma.done.wait [#allocation13], 32  }
  0x80   :  { %773 = vsyncadd [#allocation13], 4294967264  ;;  %v129_v0 = vld [vmem:[#allocation6] sm:$0xff]  ;;  %v130_v1 = vld [vmem:[#allocation6 + $0x8] sm:$0xff]  ;;  %s785_s6 = smov [#allocation15]  }
  0x81   :  { %v131_v2 = vld [vmem:[#allocation6 + $0x10] sm:$0xff]  ;;  %v512_v3 = vpack.c.bf16 %v130_v1, %v129_v0  ;;  %v132_v4 = vld [vmem:[#allocation6 + $0x18] sm:$0xff]  ;;  %v133_v6 = vld [vmem:[#allocation6 + $0x20] sm:$0xff]  ;;  %v341_v0 = vlaneseq  ;;  %s387_s30 = sshll.u32 %s785_s6, 4  ;;  %s388_s30 = int_to_ptr.vmem [resolvable:$true] %s387_s30 }
  0x82   :  { %v516_v5 = vpack.c.bf16 %v132_v4, %v131_v2  ;;  %v134_v7 = vld [vmem:[#allocation6 + $0x28] sm:$0xff]  ;;  %v135_v9 = vld [vmem:[#allocation6 + $0x30] sm:$0xff]  ;;  %v136_v10 = vld [vmem:[#allocation6 + $0x38] sm:$0xff]  ;;  %s744_s17 = scalar_lea.vmem %s388_s30, 256  ;;  %p749_p1 = scmp.lt.s32.totalorder %s388_s30, %s388_s30 }
  0x83   :  { %513 = vmatprep.subr.bf16.mxu0 %v512_v3  ;;  %v520_v8 = vpack.c.bf16 %v134_v7, %v133_v6  ;;  %v933_v11 = vld [vmem:[#allocation3] sm:$0xff]  ;;  %v231_v12 = vld [vmem:[#allocation9] sm:$0xff]  ;;  %v234_v16 = vld [vmem:[#allocation9 + $0x18] sm:$0xff]  ;;  %v524_v20 = vpack.c.bf16 %v136_v10, %v135_v9  ;;  %v342_v1 = vand.u32 127, %v341_v0  ;;  %p745_p0 = scmp.ne.s32.totalorder %s388_s30, %s744_s17  ;;  %p750_p2 = scmp.lt.s32.totalorder %s744_s17, %s744_s17 }
  0x84   :  { %515 = vmatpush3.bf16.msra.mxu0 %v512_v3  ;;  %474 = vmatprep.mubr.f32.mxu0 %v933_v11  ;;  %v232_v13 = vld [vmem:[#allocation9 + $0x8] sm:$0xff]  ;;  %v233_v14 = vld [vmem:[#allocation9 + $0x10] sm:$0xff]  ;;  %v235_v18 = vld [vmem:[#allocation9 + $0x20] sm:$0xff] }
  0x85   :  { %517 = vmatprep.subr.bf16.mxu0 %v516_v5  ;;  %v544_v15 = vpack.c.bf16 %v232_v13, %v231_v12  ;;  %v548_v17 = vpack.c.bf16 %v234_v16, %v233_v14  ;;  %v236_v19 = vld [vmem:[#allocation9 + $0x28] sm:$0xff]  ;;  %v137_v21 = vld [vmem:[#allocation6 + $0x40] sm:$0xff]  ;;  %v237_v24 = vld [vmem:[#allocation9 + $0x30] sm:$0xff]  ;;  %vm343_vm0 = vcmp.lt.s32.totalorder %v342_v1, 32  ;;  %p751_p3 = por %p750_p2, %p749_p1 }
  0x86   :  { %v138_v22 = vld [vmem:[#allocation6 + $0x48] sm:$0xff]  ;;  %v552_v23 = vpack.c.bf16 %v236_v19, %v235_v18  ;;  %v238_v25 = vld [vmem:[#allocation9 + $0x38] sm:$0xff]  ;;  %v139_v27 = vld [vmem:[#allocation6 + $0x50] sm:$0xff] }
  0x87   :  { %545 = vmatprep.subr.bf16.mxu1 %v544_v15  ;;  %v528_v26 = vpack.c.bf16 %v138_v22, %v137_v21  ;;  %v140_v28 = vld [vmem:[#allocation6 + $0x58] sm:$0xff]  ;;  %v556_v29 = vpack.c.bf16 %v238_v25, %v237_v24  ;;  %v239_v30 = vld [vmem:[#allocation9 + $0x40] sm:$0xff]  ;;  %v240_v31 = vld [vmem:[#allocation9 + $0x48] sm:$0xff]  ;;  %p752_p4 = pnand %p751_p3, %p745_p0 }
  0x88   :  { %519 = vmatpush3.bf16.msra.mxu0 %v516_v5  ;;  %547 = vmatpush3.bf16.msra.mxu1 %v544_v15  ;;  %v532_v32 = vpack.c.bf16 %v140_v28, %v139_v27  ;;  %v141_v33 = vld [vmem:[#allocation6 + $0x60] sm:$0xff]  ;;  %v142_v34 = vld [vmem:[#allocation6 + $0x68] sm:$0xff]  ;;  %v560_v35 = vpack.c.bf16 %v240_v31, %v239_v30  ;;  %v241_v36 = vld [vmem:[#allocation9 + $0x50] sm:$0xff] }
  0x89   :  { %521 = vmatprep.subr.bf16.mxu0 %v520_v8  ;;  %549 = vmatprep.subr.bf16.mxu1 %v548_v17  ;;  %v242_v37 = vld [vmem:[#allocation9 + $0x58] sm:$0xff]  ;;  %v536_v38 = vpack.c.bf16 %v142_v34, %v141_v33  ;;  %v143_v39 = vld [vmem:[#allocation6 + $0x70] sm:$0xff]  ;;  %v243_v42 = vld [vmem:[#allocation9 + $0x60] sm:$0xff] }
  0x8a   :  { %v144_v40 = vld [vmem:[#allocation6 + $0x78] sm:$0xff]  ;;  %v564_v41 = vpack.c.bf16 %v242_v37, %v241_v36  ;;  %v244_v43 = vld [vmem:[#allocation9 + $0x68] sm:$0xff]  ;;  %v403_v50 = vld [vmem:[#allocation8] ss:$0 sm:$0xff] }
  0x8b   :  { %v540_v44 = vpack.c.bf16 %v144_v40, %v143_v39  ;;  %v568_v45 = vpack.c.bf16 %v244_v43, %v243_v42  ;;  %v128_v46 = vld [vmem:[#allocation3 + $0x8] sm:$0xff]  ;;  %v402_v57 = vld [vmem:[#allocation11] ss:$0 sm:$0xff]  ;;  %v404_v19 = vld [vmem:[#allocation12] ss:$0 sm:$0xff] }
  0x8c   :  { %523 = vmatpush3.bf16.msra.mxu0 %v520_v8  ;;  %551 = vmatpush3.bf16.msra.mxu1 %v548_v17  ;;  %v245_v47 = vld [vmem:[#allocation9 + $0x70] sm:$0xff]  ;;  %v246_v48 = vld [vmem:[#allocation9 + $0x78] sm:$0xff]  ;;  %v405_v21 = vld [vmem:[#allocation14] ss:$0 sm:$0xff] }
  0x8d   :  { %525 = vmatprep.subr.bf16.mxu0 %v524_v20  ;;  %553 = vmatprep.subr.bf16.mxu1 %v552_v23  ;;  %v572_v49 = vpack.c.bf16 %v246_v48, %v245_v47 }
  0x90   :  { %527 = vmatpush3.bf16.msra.mxu0 %v524_v20  ;;  %555 = vmatpush3.bf16.msra.mxu1 %v552_v23 }
  0x91   :  { %529 = vmatprep.subr.bf16.mxu0 %v528_v26  ;;  %557 = vmatprep.subr.bf16.mxu1 %v556_v29 }
  0x94   :  { %531 = vmatpush3.bf16.msra.mxu0 %v528_v26  ;;  %559 = vmatpush3.bf16.msra.mxu1 %v556_v29 }
  0x95   :  { %533 = vmatprep.subr.bf16.mxu0 %v532_v32  ;;  %561 = vmatprep.subr.bf16.mxu1 %v560_v35 }
  0x98   :  { %535 = vmatpush3.bf16.msra.mxu0 %v532_v32  ;;  %563 = vmatpush3.bf16.msra.mxu1 %v560_v35 }
  0x99   :  { %537 = vmatprep.subr.bf16.mxu0 %v536_v38  ;;  %565 = vmatprep.subr.bf16.mxu1 %v564_v41 }
  0x9c   :  { %539 = vmatpush3.bf16.msra.mxu0 %v536_v38  ;;  %567 = vmatpush3.bf16.msra.mxu1 %v564_v41 }
  0x9d   :  { %541 = vmatprep.subr.bf16.mxu0 %v540_v44  ;;  %569 = vmatprep.subr.bf16.mxu1 %v568_v45 }
  0xa0   :  { %543 = vmatpush3.bf16.msra.mxu0 %v540_v44  ;;  %571 = vmatpush3.bf16.msra.mxu1 %v568_v45 }
  0xa1   :  { %573 = vmatprep.subr.bf16.mxu1 %v572_v49 }
  0xa3   :  { %475 = vmatmul.mubr.f32.vlgmr.msra.gmra.mrb[0].mxu0 %v128_v46 }
  0xa4   :  { %575 = vmatpush3.bf16.msra.mxu1 %v572_v49 }
 0x176   :  { %v476_v51 = vpop.f32.mrb[0].mxu0 }
 0x177   :  { %v224_v52 = vadd.f32 %v476_v51, %v403_v50  ;;  %v218_v53 = vpop.f32.mrb[1].mxu0 }
 0x178   :  { %v219_v54 = vadd.f32 %v403_v50, %v218_v53 }
 0x179   :  { %v228_v56 = vmax.f32 %v224_v52, 0.0 }
 0x17a   :  { %v227_v55 = vmax.f32 %v219_v54, 0.0 }
 0x17c   :  { %509 = vmatprep.mubr.f32.mxu1 %v227_v55 }
 0x17d   :  { %510 = vmatmul.mubr.f32.vlgmr.msra.gmra.mrb[0].mxu1 %v228_v56 }
 0x250   :  { %v511_v58 = vpop.f32.mrb[0].mxu1 }
 0x251   :  { %v313_v59 = vpop.f32.mrb[1].mxu1  ;;  %v323_v61 = vadd.f32 %v511_v58, %v402_v57 }
 0x252   :  { %v322_v60 = vadd.f32 %v402_v57, %v313_v59 }
 0x253   :  { %v332_v63 = vadd.f32 %v323_v61, %v128_v46 }
 0x254   :  { %v331_v62 = vadd.f32 %v322_v60, %v933_v11 }
 0x256   :  { %333 = vadd.xlane.f32.xlu0 %v331_v62 }
 0x25a   :  { %335 = vadd.xlane.f32.xlu0 %v332_v63 }
 0x2e3   :  { %v334_v2 = vpop.xlane.xlu0 %333 }
 0x2e4   :  { %v337_v3 = vmul.f32 0.03125, %v334_v2 }
 0x2e6   :  { %v339_v4 = vsub.f32 %v331_v62, %v337_v3 }
 0x2e7   :  { %v336_v5 = vpop.xlane.xlu0 %335 }
 0x2e8   :  { %v338_v6 = vmul.f32 0.03125, %v336_v5  ;;  %v346_v7 = vsel %vm343_vm0, %v339_v4, 0.0 }
 0x2e9   :  { %v348_v8 = vmul.f32 %v346_v7, %v346_v7 }
 0x2ea   :  { %v340_v9 = vsub.f32 %v332_v63, %v338_v6 }
 0x2eb   :  { %350 = vadd.xlane.f32.xlu1 %v348_v8 }
 0x2ec   :  { %v347_v10 = vsel %vm343_vm0, %v340_v9, 0.0 }
 0x2ed   :  { %v349_v12 = vmul.f32 %v347_v10, %v347_v10 }
 0x2ef   :  { %352 = vadd.xlane.f32.xlu1 %v349_v12 }
 0x378   :  { %v351_v13 = vpop.xlane.xlu1 %350 }
 0x379   :  { %v354_v11 = vmul.f32 0.03125, %v351_v13 }
 0x37b   :  { %v356_v14 = vadd.f32 1e-05, %v354_v11 }
 0x37c   :  { %v353_v15 = vpop.xlane.xlu1 %352 }
 0x37d   :  { %586 = vrsqrt.f32 %v356_v14  ;;  %v355_v16 = vmul.f32 0.03125, %v353_v15 }
 0x37f   :  { %v357_v17 = vadd.f32 1e-05, %v355_v16 }
 0x381   :  { %588 = vrsqrt.f32 %v357_v17 }
 0x387   :  { %v587_v18 = vpop.eup %586 }
 0x388   :  { %v360_v20 = vmul.f32 %v587_v18, %v346_v7 }
 0x38a   :  { %v369_v22 = vmul.f32 %v404_v19, %v360_v20 }
 0x38b   :  { %v589_v23 = vpop.eup %588 }
 0x38c   :  { %v361_v24 = vmul.f32 %v589_v23, %v347_v10  ;;  %v378_v25 = vadd.f32 %v405_v21, %v369_v22 }
 0x38e   :  { %v370_v26 = vmul.f32 %v404_v19, %v361_v24  ;;  %380 = vst [vmem:[#allocation15] sm:$0xff] %v378_v25 }
 0x390   :  { %v379_v27 = vadd.f32 %v405_v21, %v370_v26 }
 0x392   :  { %381 = vst [vmem:[#allocation15 + $0x8] sm:$0xff] %v379_v27 }
 0x393   :  { %755 = shalt.err (!%p752_p4)
}
 0x394   :  { %s756_s20 = scalar_lea.hbm %s959_s7, 256 }
 0x395   :  { %p757_p5 = scmp.ne.s32.totalorder %s959_s7, %s756_s20  ;;  %p760_p6 = scmp.lt.u32.totalorder %s756_s20, %s959_s7 }
 0x397   :  { %p762_p7 = pnand %p760_p6, %p757_p5 }
 0x399   :  { %765 = shalt.err (!%p762_p7)
}
 0x39a   :  { %393 = dma.vmem_to_hbm [thread:$0]  %s388_s30, 256, %s959_s7, [#allocation5], %s778_s13, %s778_s13, %s779_s14  }
 0x39b   :  { %774 = dma.done.wait [#allocation5], 256  }
 0x39c   :  { %775 = vsyncadd [#allocation5], 4294967040 }
 0x39d   :  { %397 = vsyncpa [#allocation4], 1 }
 0x39e   :  { %398 = vsyncpa [#allocation7], 1 }
 0x39f   :  { %399 = vsyncpa [#allocation10], 1 }
 0x3a0   :  { %400 = vsyncpa [#allocation13], 1 }
 0x3a1   :  { %401 = vsyncpa [#allocation5], 1 }

</bundles_post_ra>
